<compile_context>
chip_gen: v5e
topology: v5e:2x2
jax: 0.10.0
libtpu: 0.0.40
codegen_flags: <defaults>
</compile_context>

<pallas_src>
from functools import lru_cache
from itertools import permutations

import numpy as np
import jax
import jax.numpy as jnp
from jax.experimental import pallas as pl
from jax.experimental.pallas import tpu as pltpu

try:  # optimal host-side matching (reference uses scipy); brute-force fallback
    from scipy.optimize import linear_sum_assignment as _scipy_lsa
except Exception:  # pragma: no cover
    _scipy_lsa = None


def _round_up(x, m):
    return ((x + m - 1) // m) * m


def _cdiv(a, b):
    return -(-a // b)


# ------------------------------ Pallas kernel ------------------------------ #

def _pair_cost_kernel(t_ref, p_ref, out_ref):
    # t_ref: (TM, 8) packed target factors; p_ref: (8, TN) packed pred factors.
    # total(m, n) = sum_k T[m, k] * P[k, n]
    #   = (t_pt - p_pt)^2 + (t_eta - p_eta)^2 + 1 - cos((t_phi - p_phi) * std)
    # Rank-6 outer product evaluated on the MXU; the VALU stays idle so the
    # kernel is limited purely by the single f32 output stream (HBM writeback).
    out_ref[...] = jnp.dot(t_ref[...], p_ref[...],
                           preferred_element_type=jnp.float32,
                           precision=jax.lax.Precision.HIGHEST)


def _col_tiling(bn):
    """Lane-dense column tiling with >= 2 tiles (keeps both v7x TCs busy)."""
    cols0 = _round_up(bn, 128)
    if cols0 <= 128:
        return 128, 256                      # pad to two tiles of 128
    ntiles = max(2, _cdiv(cols0, 512))
    tn = min(512, _round_up(_cdiv(cols0, ntiles), 128))
    return tn, _round_up(cols0, tn)


def _row_tiling(bn):
    rows0 = _round_up(bn, 8)
    tm = min(512, rows0)
    return tm, _round_up(rows0, tm)


@jax.jit
def pairwise_total_cost(target_pt, target_eta, target_phi, pred_ptetaphi, phi_std):
    """Total pairwise cost, zero-padded to (rows, cols); valid region [:BN, :BN]."""
    bn = target_pt.shape[0]
    tm, rows = _row_tiling(bn)
    tn, cols = _col_tiling(bn)

    f32 = jnp.float32
    phi_std = jnp.asarray(phi_std, f32)

    t_pt = target_pt.astype(f32)
    t_eta = target_eta.astype(f32)
    t_phi_s = target_phi.astype(f32) * phi_std           # phi_mean cancels in (a-b)
    p_pt = pred_ptetaphi[:, 0].astype(f32)
    p_eta = pred_ptetaphi[:, 1].astype(f32)
    p_phi_s = pred_ptetaphi[:, 2].astype(f32) * phi_std

    ones = jnp.ones((bn,), f32)
    # Rank-6 factorization of the total pair cost (O(BN) prologue incl. cos/sin).
    t_cols = jnp.stack([t_pt * t_pt + t_eta * t_eta + 1.0,
                        -2.0 * t_pt,
                        -2.0 * t_eta,
                        ones,
                        -jnp.cos(t_phi_s),
                        -jnp.sin(t_phi_s)], axis=1)       # (bn, 6)
    p_rows = jnp.stack([ones,
                        p_pt,
                        p_eta,
                        p_pt * p_pt + p_eta * p_eta,
                        jnp.cos(p_phi_s),
                        jnp.sin(p_phi_s)], axis=0)        # (6, bn)

    t_feat = jnp.zeros((rows, 8), f32).at[:bn, :6].set(t_cols)   # column slab
    p_feat = jnp.zeros((8, cols), f32).at[:6, :bn].set(p_rows)   # row slab

    return pl.pallas_call(
        _pair_cost_kernel,
        grid=(rows // tm, cols // tn),                    # cols = fast axis
        in_specs=[pl.BlockSpec((tm, 8), lambda i, j: (i, 0)),   # constant in j
                  pl.BlockSpec((8, tn), lambda i, j: (0, j))],
        out_specs=pl.BlockSpec((tm, tn), lambda i, j: (i, j)),
        out_shape=jax.ShapeDtypeStruct((rows, cols), f32),
        compiler_params=pltpu.CompilerParams(
            dimension_semantics=("parallel", "parallel")),
    )(t_feat, p_feat)


# ----------------------- cross entropy (plain jnp/XLA) --------------------- #

def cross_entropy_mean(logits, labels):
    # Performance review: a standalone pallas_call for a (2,16) CE is pure
    # launch overhead; plain XLA fuses it with surrounding ops instead.
    logits = logits.astype(jnp.float32)
    labels = jnp.clip(labels.astype(jnp.int32), 0, logits.shape[-1] - 1)
    lse = jax.nn.logsumexp(logits, axis=-1)
    picked = jnp.take_along_axis(logits, labels[:, None], axis=-1)[:, 0]
    return jnp.mean(lse - picked)


# ------------------------------ host-side glue ----------------------------- #

@lru_cache(maxsize=None)
def _perm_table(n):
    return np.array(list(permutations(range(n))), dtype=np.int64)


def _min_cost_assignment(cost):
    """Optimal assignment; scipy when available, cached brute force otherwise."""
    n = cost.shape[0]
    if _scipy_lsa is not None:
        r, c = _scipy_lsa(cost)
        return np.asarray(r), np.asarray(c)
    # TODO(synk): O(n!) fallback only viable for small n (used when scipy absent).
    perms = _perm_table(n)
    sums = cost[np.arange(n)[None, :], perms].sum(axis=1)
    return np.arange(n), perms[int(np.argmin(sums))]


def _undo_scaling(inp, vt):
    inp = np.array(inp, copy=True)
    inp[:, 0] = inp[:, 0] * vt['pflow_pt']['std'] + vt['pflow_pt']['mean']
    inp[:, 1] = inp[:, 1] * vt['pflow_eta']['std'] + vt['pflow_eta']['mean']
    phi = inp[:, 2] * vt['pflow_phi']['std'] + vt['pflow_phi']['mean']
    # vectorized equivalent of the reference's per-element while loops
    inp[:, 2] = (phi + np.pi) % (2.0 * np.pi) - np.pi
    return inp


def set2set_loss_forward(target_pt, target_eta, target_phi, pred_ptetaphi,
                         set_size_pred, batch_num_nodes, batch_size,
                         var_transform, scatter=True):
    B = int(batch_size)
    BN = int(target_pt.shape[0])
    N = BN // B
    phi_std = float(var_transform['pflow_phi']['std'])

    # One Pallas launch + exactly one device->host copy of the total-cost slab.
    total_pad = pairwise_total_cost(target_pt, target_eta, target_phi,
                                    pred_ptetaphi, phi_std)
    total_np = np.asarray(total_pad)

    # Raw 1-D features on host: per-component recovery only at matched pairs.
    t_pt_np = np.asarray(target_pt, dtype=np.float64)
    t_eta_np = np.asarray(target_eta, dtype=np.float64)
    t_phi_np = np.asarray(target_phi, dtype=np.float64)
    pred_np = np.asarray(pred_ptetaphi, dtype=np.float64)

    matrix = np.zeros((B, B))
    matrix_pt = np.zeros((B, B))
    matrix_eta = np.zeros((B, B))
    matrix_phi = np.zeros((B, B))
    # TODO(synk): scipy linear_sum_assignment / min_weight_full_bipartite_matching
    # are sequential combinatorial host algorithms with no Pallas equivalent.
    for i in range(B):
        for j in range(B):
            blk = total_np[i * N:(i + 1) * N, j * N:(j + 1) * N]
            rows_idx, cols_idx = _min_cost_assignment(blk)
            ti = i * N + rows_idx
            pj = j * N + cols_idx
            pt_m = np.mean((pred_np[pj, 0] - t_pt_np[ti]) ** 2)
            eta_m = np.mean((pred_np[pj, 1] - t_eta_np[ti]) ** 2)
            phi_m = np.mean(1.0 - np.cos((t_phi_np[ti] - pred_np[pj, 2]) * phi_std))
            matrix_pt[i, j] = pt_m
            matrix_eta[i, j] = eta_m
            matrix_phi[i, j] = phi_m
            matrix[i, j] = pt_m + eta_m + phi_m

    pflow_idx, fastsim_idx = _min_cost_assignment(matrix)

    kin_loss = pt_loss = eta_loss = phi_loss = 0.0
    for i in range(B):
        kin_loss += matrix[pflow_idx[i], fastsim_idx[i]] / B
        pt_loss += matrix_pt[pflow_idx[i], fastsim_idx[i]] / B
        eta_loss += matrix_eta[pflow_idx[i], fastsim_idx[i]] / B
        phi_loss += matrix_phi[pflow_idx[i], fastsim_idx[i]] / B

    num_loss = cross_entropy_mean(set_size_pred, batch_num_nodes)
    total_loss = jnp.asarray(kin_loss, dtype=jnp.float32) + num_loss

    out = {
        'total_loss': total_loss,
        'kin_loss': jnp.asarray(kin_loss, dtype=jnp.float32),
        'pt_loss': jnp.asarray(pt_loss, dtype=jnp.float32),
        'eta_loss': jnp.asarray(eta_loss, dtype=jnp.float32),
        'phi_loss': jnp.asarray(phi_loss, dtype=jnp.float32),
        'num_loss': num_loss,
    }

    if scatter:
        target_ptetaphi = np.stack([t_pt_np, t_eta_np, t_phi_np], axis=1)
        out['ptetaphi'] = [_undo_scaling(target_ptetaphi, var_transform),
                           _undo_scaling(pred_np.copy(), var_transform)]
        pred_set_size = np.argmax(np.asarray(set_size_pred), axis=1)
        out['set_size'] = [np.asarray(batch_num_nodes), pred_set_size]
    return out


# ---------------------------------- main ----------------------------------- #

if __name__ == "__main__":
    B, N, C = 2, 8, 16   # batch events, particles per event, set-size classes

    var_transform = {
        'pflow_pt':  {'mean': 1.5,  'std': 0.8},
        'pflow_eta': {'mean': 0.0,  'std': 1.2},
        'pflow_phi': {'mean': 0.05, 'std': 0.9},
    }

    key = jax.random.PRNGKey(0)
    k1, k2, k3, k4, k5 = jax.random.split(key, 5)
    target_pt = jax.random.normal(k1, (B * N,), jnp.float32)
    target_eta = jax.random.normal(k2, (B * N,), jnp.float32)
    target_phi = jax.random.normal(k3, (B * N,), jnp.float32)
    pred_ptetaphi = jax.random.normal(k4, (B * N, 3), jnp.float32)
    set_size_pred = jax.random.normal(k5, (B, C), jnp.float32)
    batch_num_nodes = jnp.full((B,), N, dtype=jnp.int32)

    result = set2set_loss_forward(target_pt, target_eta, target_phi,
                                  pred_ptetaphi, set_size_pred, batch_num_nodes,
                                  batch_size=B, var_transform=var_transform,
                                  scatter=True)
    jax.block_until_ready(result['total_loss'])
    jax.block_until_ready(result['num_loss'])
    print("KERNEL_OK")
</pallas_src>

<mosaic_0001>
module attributes {stable_mosaic.version = 11 : i64} {
  func.func @_pair_cost_kernel(%arg0: i32, %arg1: i32, %arg2: memref<16x8xf32, #tpu.memory_space<vmem>>, %arg3: memref<8x128xf32, #tpu.memory_space<vmem>>, %arg4: memref<16x128xf32, #tpu.memory_space<vmem>>) attributes {dimension_semantics = [#tpu.dimension_semantics<parallel>, #tpu.dimension_semantics<parallel>], iteration_bounds = array<i64: 1, 2>, scalar_prefetch = 0 : i64, scratch_operands = 0 : i64, tpu.core_type = #tpu.core_type<tc>, window_params = [{transform_indices = @transform_0, window_bounds = array<i64: 16, 8>}, {transform_indices = @transform_1, window_bounds = array<i64: 8, 128>}, {transform_indices = @transform_2, window_bounds = array<i64: 16, 128>}]} {
    %c0 = arith.constant 0 : index
    %c0_0 = arith.constant 0 : index
    %0 = vector.load %arg2[%c0, %c0_0] : memref<16x8xf32, #tpu.memory_space<vmem>>, vector<16x8xf32>
    %c0_1 = arith.constant 0 : index
    %c0_2 = arith.constant 0 : index
    %1 = vector.load %arg3[%c0_1, %c0_2] : memref<8x128xf32, #tpu.memory_space<vmem>>, vector<8x128xf32>
    %cst = arith.constant dense<0.000000e+00> : vector<16x128xf32>
    %2 = tpu.matmul %0, %1, %cst {dimension_numbers = #tpu.dot_dimension_numbers<[1], [0], [0], [1], [0, 0, 1, 1], [], []>, precision = #tpu.contract_precision<fp32>} : vector<16x8xf32>, vector<8x128xf32>, vector<16x128xf32> -> vector<16x128xf32>
    %c0_3 = arith.constant 0 : index
    %c0_4 = arith.constant 0 : index
    %3 = vector.load %arg4[%c0_3, %c0_4] : memref<16x128xf32, #tpu.memory_space<vmem>>, vector<16x128xf32>
    tpu.vector_store %arg4[%c0_3, %c0_4], %2 {strides = array<i32>} : memref<16x128xf32, #tpu.memory_space<vmem>>, vector<16x128xf32>,
    return
  }
  func.func @transform_0(%arg0: i32, %arg1: i32) -> (i32, i32) {
    %c0_i32 = arith.constant 0 : i32
    %c0_i32_0 = arith.constant 0 : i32
    return %arg0, %c0_i32 : i32, i32
  }
  func.func @transform_1(%arg0: i32, %arg1: i32) -> (i32, i32) {
    %c0_i32 = arith.constant 0 : i32
    %c0_i32_0 = arith.constant 0 : i32
    return %c0_i32, %arg1 : i32, i32
  }
  func.func @transform_2(%arg0: i32, %arg1: i32) -> (i32, i32) {
    %c0_i32 = arith.constant 0 : i32
    return %arg0, %arg1 : i32, i32
  }
}

</mosaic_0001>

<bundles_post_ra>
// kernel: pairwise_total_cost.1
= control target key start
LH: loop header
LB: loop body
LE: loop exit
PB: predicated region body
PF: predicated region fallthrough
CT: control target
= control target key end

     0   :  { %7 = vsyncpa [#allocation3], 0  ;;  %s743_s0 = inlined_call_operand.vmem [shape: f32[16,8], index: 0, kind: input, shape index: {}]   ;;  %s744_s1 = inlined_call_operand.vmem [shape: f32[8,256], index: 1, kind: input, shape index: {}]   ;;  %s745_s2 = inlined_call_operand.hbm [shape: f32[16,256], index: 2, kind: output, shape index: {}]  }
   0x1   :  { %9 = vsyncpa [#allocation3 + $0x1], 0  ;;  %s640_s9 = smov 0   ;;  %s642_s10 = smov 0  }
   0x2   :  { %s644_s11 = smov 0   ;;  %s646_s12 = smov 0  }
   0x3   :  { %s648_s13 = smov 0   ;;  %s650_s14 = smov 0  }
   0x4 LB: > { %s470_s15 = sadd.s32 4294967295, %s620_s14   ;;  %s471_s16 = sadd.s32 4294967294, %s620_s14   ;;  %s620_s14 = sphi %s650_s14, %s15_s14   ;;  %s616_s13 = sphi %s648_s13, %s752_s13   ;;  %s612_s12 = sphi %s646_s12, %s751_s12   ;;  %s608_s11 = sphi %s644_s11, %s750_s11   ;;  %s604_s10 = sphi %s642_s10, %s749_s10   ;;  %s600_s9 = sphi %s640_s9, %s748_s9  }
   0x5   : > { %s24_s17 = sadd.s32 1, %s616_s13  ;;  %s88_s18 = sadd.s32 1, %s608_s11 }
   0x6   : > { %p25_p0 = scmp.ge.s32.totalorder %s24_s17, 2  ;;  %p98_p1 = scmp.ne.s32.totalorder %s608_s11, %s604_s10 }
   0x7   : > { %p99_p2 = scmp.eq.s32.totalorder %s470_s15, 1  ;;  %p104_p3 = scmp.ne.s32.totalorder %s604_s10, %s600_s9 }
   0x8   : > { %s754_s17 = smov (%p25_p0, %s24_s17), 0  ;;  %p105_p5 = scmp.eq.s32.totalorder %s471_s16, 1 }
   0x9   : > { %p680_p4 = por %p99_p2, %p98_p1  ;;  %s84_s20 = ssub.s32 %s616_s13, %s754_s17 }
   0xa   : > { %p475_p6 = scmp.ge.s32.totalorder %s620_s14, 1  ;;  %p86_p7 = scmp.eq.s32.totalorder %s84_s20, 0 }
   0xb   : > { %p687_p8 = por %p105_p5, %p104_p3  ;;  %p139_p9 = scmp.lt.s32.totalorder %s620_s14, 3 }
   0xc   : > { %s693_s22 = scalar_select %p86_p7, %s608_s11, %s88_s18  }
   0xd   : > { %p140_p10 = pnand %p475_p6, %p139_p9 }
   0xe   : > { %p171_p11 = scmp.lt.s32.totalorder (!%p140_p10), %s612_s12, 1  ;;  %s162_s4 = sand.u32 (!%p140_p10), 1, %s604_s10  }
   0xf   : > { %143 = sbr.rel (%p140_p10) target bundleno = 195 (0xc3), region = 28  ;;  %s476_s5 = sshll.u32 (!%p140_p10), %s162_s4, 4 }
  0x10   : > { %s479_s6 = sshll.u32 (!%p140_p10), %s612_s12, 3  ;;  %s164_s16 = scalar_lea.vmem (!%p140_p10), [#allocation2], %s476_s5 }
  0x11   : > { %s379_s15 = scalar_lea.hbm (!%p140_p10), %s745_s2, %s479_s6  ;;  %s380_s18 = sshll.u32 (!%p140_p10), %s164_s16, 4  ;;  %s381_s18 = int_to_ptr.vmem [resolvable:$true] %s380_s18 }
  0x12   : > { %s382_s20 = sshll.u32 (!%p140_p10), %s379_s15, 4  ;;  %s383_s20 = int_to_ptr.hbm [resolvable:$true] %s382_s20 }
  0x13   : > { %s556_s23 = sshra.s32 (!%p140_p10), %s383_s20, 4  ;;  %s557_s23 = int_to_ptr.hbm [resolvable:$true] %s556_s23 }
  0x14   : > { %v177_v0 = vld [vmem:[%s743_s0 + $0x8] sm:$0xff]  ;;  %vm179_vm0 = vcmask 64512   ;;  %v176_v1 = vld [vmem:[%s743_s0] sm:$0xff]  ;;  %s172_s27 = scalar_select %p171_p11, %s612_s12, 1 }
  0x15   : > { %v184_v2 = vsel %vm179_vm0, %v177_v0, 0  ;;  %v181_v3 = vsel %vm179_vm0, %v176_v1, 0  ;;  %s366_s12 = scalar_lea.sflag [#allocation3], %s162_s4  ;;  %s558_s24 = scalar_lea.hbm %s557_s23, 16 }
  0x16   : > { %v211_v4 = vand.u32 4294901760, %v184_v2  ;;  %v203_v5 = vand.u32 4294901760, %v181_v3  ;;  %s477_s28 = sshll.u32 %s172_s27, 3  ;;  %p559_p12 = scmp.ne.s32.totalorder %s557_s23, %s558_s24 }
  0x17   : > { %s174_s3 = scalar_lea.vmem %s744_s1, %s477_s28  ;;  %s562_s27 = scalar_lea.hbm %s745_s2, 32 }
  0x18   : > { %v212_v6 = vsub.f32 %v184_v2, %v211_v4  ;;  %v204_v7 = vsub.f32 %v181_v3, %v203_v5  ;;  %v178_v8 = vld [vmem:[%s174_s3] sm:$0xff]  ;;  %p560_p13 = pnand %p559_p12, %p680_p4  ;;  %p563_p1 = scmp.lt.s32.totalorder %s557_s23, %s745_s2 }
  0x19   : > { %v201_v11 = vand.u32 4294901760, %v178_v8  ;;  %p564_p2 = scmp.lt.s32.totalorder %s562_s27, %s558_s24 }
  0x1a   : > { %v213_v9 = vand.u32 4294901760, %v212_v6  ;;  %v205_v10 = vand.u32 4294901760, %v204_v7  ;;  %p561_p0 = pneg %p560_p13 }
  0x1b   : > { %482 = vmatpush.msra.mxu2 %v201_v11  ;;  %v236_v14 = vsub.f32 %v178_v8, %v201_v11  ;;  %202 = vmatpush.msra.mxu0 %v201_v11  ;;  %p565_p3 = por %p564_p2, %p563_p1 }
  0x1c   : > { %v214_v12 = vsub.f32 %v212_v6, %v213_v9  ;;  %v206_v13 = vsub.f32 %v204_v7, %v205_v10 }
  0x1d   : > { %267 = vmatpush.msrb.mxu2 %v236_v14  ;;  %v237_v17 = vand.u32 4294901760, %v236_v14  ;;  %p566_p5 = pnand %p565_p3, %p561_p0 }
  0x1e   : > { %v215_v15 = vand.u32 4294901760, %v214_v12  ;;  %v207_v16 = vand.u32 4294901760, %v206_v13 }
  0x1f   : > { %v238_v18 = vsub.f32 %v236_v14, %v237_v17  ;;  %327 = vmatpush.msrb.mxu0 %v237_v17 }
  0x20   : > { %216 = vmatmul.f32.vlgmr.msra.gmra.mxu2 %v215_v15  ;;  %208 = vmatmul.f32.vlgmr.msra.gmra.mxu0 %v207_v16 }
  0x21   : > { %v239_v19 = vand.u32 4294901760, %v238_v18 }
  0x23   : > { %483 = vmatpush.msra.mxu3 %v239_v19  ;;  %240 = vmatpush.msra.mxu1 %v239_v19 }
  0x24   : > { %246 = vmatmul.f32.vlgmr.msra.gmra.mxu3 %v211_v4  ;;  %242 = vmatmul.f32.vlgmr.msra.gmra.mxu1 %v203_v5 }
  0x25   : > { %295 = vmatpush.msrb.mxu3 %v201_v11  ;;  %353 = vmatpush.msrb.mxu1 %v201_v11 }
  0x28   : > { %270 = vmatmul.f32.vlgmr.msrb.gmra.mxu2 %v204_v7  ;;  %329 = vmatmul.f32.vlgmr.msrb.gmra.mxu0 %v203_v5 }
  0x2c   : > { %299 = vmatmul.f32.vlgmr.msrb.gmra.mxu3 %v205_v10  ;;  %355 = vmatmul.f32.vlgmr.msrb.gmra.mxu1 %v203_v5 }
  0x30   : > { %275 = vmatmul.f32.gmra.mxu2 %v212_v6  ;;  %333 = vmatmul.f32.gmra.mxu0 %v211_v4 }
  0x34   : > { %305 = vmatmul.f32.gmra.mxu3 %v213_v9  ;;  %359 = vmatmul.f32.gmra.mxu1 %v211_v4 }
  0x9d   : > { %v209_v21 = vpop.f32.mrf.mxu0 }
  0xa1   : > { %v243_v23 = vpop.f32.mrf.mxu1 }
  0xa2   : > { %v244_v25 = vadd.f32 %v243_v23, %v209_v21 }
  0xa3   : > { %v217_v20 = vpop.f32.mrf.mxu2 }
  0xa5   : > { %v330_v26 = vpop.f32.mrf.mxu0 }
  0xa7   : > { %v247_v22 = vpop.f32.mrf.mxu3 }
  0xa8   : > { %v248_v33 = vadd.f32 %v247_v22, %v217_v20 }
  0xa9   : > { %v356_v29 = vpop.f32.mrf.mxu1 }
  0xab   : > { %v271_v24 = vpop.f32.mrf.mxu2 }
  0xac   : > { %v272_v27 = vadd.f32 %v271_v24, %v244_v25 }
  0xad   : > { %v334_v37 = vpop.f32.mrf.mxu0 }
  0xaf   : > { %v300_v28 = vpop.f32.mrf.mxu3 }
  0xb0   : > { %v301_v30 = vadd.f32 %v300_v28, %v272_v27 }
  0xb1   : > { %v360_v39 = vpop.f32.mrf.mxu1 }
  0xb2   : > { %v331_v31 = vadd.f32 %v330_v26, %v301_v30 }
  0xb3   : > { %v276_v32 = vpop.f32.mrf.mxu2 }
  0xb4   : > { %v357_v34 = vadd.f32 %v356_v29, %v331_v31  ;;  %v277_v35 = vadd.f32 %v276_v32, %v248_v33 }
  0xb6   : > { %363 = vst [vmem:[%s164_s16] sm:$0xff] %v357_v34 }
  0xb7   : > { %v306_v36 = vpop.f32.mrf.mxu3 }
  0xb8   : > { %v307_v38 = vadd.f32 %v306_v36, %v277_v35 }
  0xba   : > { %v335_v40 = vadd.f32 %v334_v37, %v307_v38 }
  0xbc   : > { %v361_v41 = vadd.f32 %v360_v39, %v335_v40 }
  0xbe   : > { %364 = vst [vmem:[%s164_s16 + $0x8] sm:$0xff] %v361_v41 }
  0xbf   : > { %569 = shalt.err (!%p566_p5)
}
  0xc0   : > { %s622_s30 = smov 128   ;;  %s623_s3 = smov 256  }
  0xc1   : > { %s624_s4 = smov 8  }
  0xc2   : > { %484 = dma.vmem_to_hbm [thread:$0]  (%p680_p4), %s381_s18, 256, %s383_s20, %s366_s12, %s622_s30, %s623_s3, %s624_s4  }
  0xc3 PF: > { %p490_p6 = scmp.ge.s32.totalorder %s620_s14, 2  ;;  %s397_s5 = sand.u32 1, %s600_s9  }
  0xc4   : > { %s398_s6 = scalar_lea.sflag [#allocation3], %s397_s5 }
  0xc5   : > { %p487_p7 = pnand %p490_p6, %p687_p8 }
  0xc7   : > { %p488_p9 = pneg %p487_p7 }
  0xc9   : > { %595 = dma.done.wait (%p488_p9), %s398_s6, 256  }
  0xca   : > { %597 = vsyncadd (%p488_p9), %s398_s6, 4294967040  ;;  %s15_s14 = sadd.s32 1, %s620_s14   ;;  %s748_s9 = smov %s604_s10 }
  0xcb   : > { %p12_p10 = scmp.ge.s32.totalorder %s15_s14, 4   ;;  %s749_s10 = smov %s608_s11 }
  0xcc   : > { %s750_s11 = smov %s693_s22  ;;  %s751_s12 = smov %s616_s13 }
  0xcd   : > { %s752_s13 = smov %s754_s17  ;;  %14 = sbr.rel (!%p12_p10) target bundleno = 4 (0x4), region = 66 }
  0xd2   :  { %404 = vsyncpa [#allocation3], 1 }
  0xd3   :  { %406 = vsyncpa [#allocation3 + $0x1], 1 }

</bundles_post_ra>
